<compile_context>
chip_gen: v7x
topology: tpu7x:2x2x1
jax: 0.10.0
libtpu: 0.0.40
codegen_flags: <defaults>
</compile_context>

<pallas_src>
import functools

import jax
import jax.numpy as jnp
from jax.experimental import pallas as pl
from jax.experimental.pallas import tpu as pltpu


def _round_up(x, m):
    return ((x + m - 1) // m) * m


def _ubr_smooth_l1_kernel(gt_ref, rois_ref, pred_ref, out_ref, *,
                          overlap_threshold):
    # rois_ref / pred_ref: [4, 8, L] VMEM (L = tile_n // 8, L % 128 == 0)
    # gt_ref:              [G, 4]    SMEM (scalar reads, splat into vregs)
    # out_ref:             [8, 8, L] VMEM packed output slab
    ax1 = rois_ref[0]                       # [8, L] full-vreg tiles
    ay1 = rois_ref[1]
    ax2 = rois_ref[2]
    ay2 = rois_ref[3]
    area_a = (ax2 - ax1) * (ay2 - ay1)      # [8, L]

    num_gt = gt_ref.shape[0]

    # --- fused IoU max / first-argmax / matched-gt gather over G (unrolled) --
    max_iou = None
    max_idx = None
    gx1 = gy1 = gx2 = gy2 = None
    for g in range(num_gt):
        bx1 = gt_ref[g, 0]                  # SMEM scalar reads
        by1 = gt_ref[g, 1]
        bx2 = gt_ref[g, 2]
        by2 = gt_ref[g, 3]
        iw = jnp.maximum(jnp.minimum(ax2, bx2) - jnp.maximum(ax1, bx1), 0.0)
        ih = jnp.maximum(jnp.minimum(ay2, by2) - jnp.maximum(ay1, by1), 0.0)
        inter = iw * ih                     # [8, L]
        area_b = (bx2 - bx1) * (by2 - by1)  # scalar
        # Exact division on purpose (see header note).
        iou_g = inter / (area_a + area_b - inter)
        if g == 0:
            max_iou = iou_g
            max_idx = jnp.zeros_like(iou_g)
            gx1, gy1, gx2, gy2 = bx1, by1, bx2, by2
        else:
            take = iou_g > max_iou          # strict '>' keeps smallest gt idx on ties
            max_iou = jnp.where(take, iou_g, max_iou)
            max_idx = jnp.where(take, jnp.float32(g), max_idx)
            gx1 = jnp.where(take, bx1, gx1)
            gy1 = jnp.where(take, by1, gy1)
            gx2 = jnp.where(take, bx2, gx2)
            gy2 = jnp.where(take, by2, gy2)

    mask = max_iou > overlap_threshold      # [8, L] bool

    # ---------------- compute_transform (encode, +1 widths) -----------------
    ew = ax2 - ax1 + 1.0
    eh = ay2 - ay1 + 1.0
    ecx = ax1 + 0.5 * ew
    ecy = ay1 + 0.5 * eh
    gw = gx2 - gx1 + 1.0
    gh = gy2 - gy1 + 1.0
    gcx = gx1 + 0.5 * gw
    gcy = gy1 + 0.5 * gh
    tdx = (gcx - ecx) / ew
    tdy = (gcy - ecy) / eh
    tdw = jnp.log(gw / ew)
    tdh = jnp.log(gh / eh)

    # ---------------- inverse_transform (decode refined rois) ---------------
    dx = pred_ref[0]
    dy = pred_ref[1]
    dw = pred_ref[2]
    dh = pred_ref[3]
    pcx = dx * ew + ecx
    pcy = dy * eh + ecy
    pw = jnp.exp(dw) * ew
    ph = jnp.exp(dh) * eh

    # --------------- smooth L1 (sigma=1), summed over 4 coords --------------
    def _sl1(d):
        ad = jnp.abs(d)
        return jnp.where(ad < 1.0, 0.5 * d * d, ad - 0.5)

    loss = _sl1(dx - tdx) + _sl1(dy - tdy) + _sl1(dw - tdw) + _sl1(dh - tdh)
    loss = jnp.where(mask, loss, 0.0)

    # ----------- direct full-tile stores (no sublane concatenate) -----------
    out_ref[0] = loss
    out_ref[1] = mask.astype(jnp.float32)
    out_ref[2] = pcx - 0.5 * pw
    out_ref[3] = pcy - 0.5 * ph
    out_ref[4] = pcx + 0.5 * pw
    out_ref[5] = pcy + 0.5 * ph
    out_ref[6] = max_iou
    out_ref[7] = max_idx


def ubr_smooth_l1_loss(rois, bbox_pred, gt_box, overlap_threshold, *,
                       tile_n=None):
    """Pallas forward of UBR_SmoothL1Loss.

    Returns (per_roi_loss [N] (0 where mask is False),
             refined_rois [N, 4],
             mask [N] bool,
             num_pos scalar int32,
             num_rois python int).
    """
    N = rois.shape[0]
    if tile_n is None:
        # Aim for ~1-2 grid steps for typical N (clamped to 1024..8192).
        # v7x users wanting both TensorCores should pass tile_n so that
        # cdiv(N, tile_n) is >= 2 and even.
        half = -(-N // 2)
        tile_n = max(1024, min(8192, _round_up(half, 1024)))
    tile_n = int(tile_n)
    assert tile_n % 1024 == 0 and tile_n >= 1024, \
        "tile_n must be a positive multiple of 1024 (sublane+lane repack)"

    num_tiles = pl.cdiv(N, tile_n)
    n_padded = num_tiles * tile_n
    n_pad = n_padded - N
    lanes = tile_n // 8                     # % 128 == 0 by construction

    rois_f = rois.astype(jnp.float32)
    pred_f = bbox_pred.astype(jnp.float32)
    if n_pad:
        # Pad with valid dummy boxes so all in-kernel math stays finite.
        pad_box = jnp.tile(jnp.array([[0.0, 0.0, 1.0, 1.0]], jnp.float32),
                           (n_pad, 1))
        rois_f = jnp.concatenate([rois_f, pad_box], axis=0)
        pred_f = jnp.concatenate(
            [pred_f, jnp.zeros((n_pad, 4), jnp.float32)], axis=0)

    # Repack N across (tile, sublane, lane): element [c, t*8+s, l] is roi
    # index t*tile_n + s*lanes + l.  Output uses the identical packing.
    rois_in = rois_f.T.reshape(4, num_tiles * 8, lanes)
    pred_in = pred_f.T.reshape(4, num_tiles * 8, lanes)
    gt_f = gt_box.astype(jnp.float32)

    kernel = functools.partial(_ubr_smooth_l1_kernel,
                               overlap_threshold=float(overlap_threshold))
    packed = pl.pallas_call(
        kernel,
        out_shape=jax.ShapeDtypeStruct((8, num_tiles * 8, lanes), jnp.float32),
        grid=(num_tiles,),
        in_specs=[
            pl.BlockSpec(memory_space=pltpu.MemorySpace.SMEM),     # gt (tiny)
            pl.BlockSpec((4, 8, lanes), lambda i: (0, i, 0)),      # rois
            pl.BlockSpec((4, 8, lanes), lambda i: (0, i, 0)),      # bbox_pred
        ],
        out_specs=pl.BlockSpec((8, 8, lanes), lambda i: (0, i, 0)),
        compiler_params=pltpu.CompilerParams(
            dimension_semantics=("parallel",)),
    )(gt_f, rois_in, pred_in)

    packed = packed.reshape(8, n_padded)    # undo the sublane repack
    loss = packed[0, :N]
    mask = packed[1, :N] > 0.5
    refined = packed[2:6, :N].T             # [N, 4]
    num_pos = jnp.sum(mask.astype(jnp.int32))
    # TODO(synk): the PyTorch module returns loss/refined only for the positive
    # rois (dynamic shape); compact with loss[mask] / refined[mask] outside jit
    # if the compacted view is required.
    return loss, refined, mask, num_pos, N


# ---------------------- pure-JAX reference (same math) ----------------------
def _reference(rois, bbox_pred, gt_box, thr):
    ax1, ay1, ax2, ay2 = rois[:, 0], rois[:, 1], rois[:, 2], rois[:, 3]
    bx1, by1, bx2, by2 = gt_box[:, 0], gt_box[:, 1], gt_box[:, 2], gt_box[:, 3]
    iw = jnp.maximum(jnp.minimum(ax2[:, None], bx2[None, :])
                     - jnp.maximum(ax1[:, None], bx1[None, :]), 0.0)
    ih = jnp.maximum(jnp.minimum(ay2[:, None], by2[None, :])
                     - jnp.maximum(ay1[:, None], by1[None, :]), 0.0)
    inter = iw * ih
    area_a = ((ax2 - ax1) * (ay2 - ay1))[:, None]
    area_b = ((bx2 - bx1) * (by2 - by1))[None, :]
    iou = inter / (area_a + area_b - inter)
    max_iou = jnp.max(iou, axis=1)
    max_idx = jnp.argmax(iou, axis=1)
    mask = max_iou > thr
    matched = gt_box[max_idx]

    ew = ax2 - ax1 + 1.0
    eh = ay2 - ay1 + 1.0
    ecx = ax1 + 0.5 * ew
    ecy = ay1 + 0.5 * eh
    gw = matched[:, 2] - matched[:, 0] + 1.0
    gh = matched[:, 3] - matched[:, 1] + 1.0
    gcx = matched[:, 0] + 0.5 * gw
    gcy = matched[:, 1] + 0.5 * gh
    targets = jnp.stack([(gcx - ecx) / ew, (gcy - ecy) / eh,
                         jnp.log(gw / ew), jnp.log(gh / eh)], axis=1)

    dx, dy, dw, dh = (bbox_pred[:, i] for i in range(4))
    pcx = dx * ew + ecx
    pcy = dy * eh + ecy
    pw = jnp.exp(dw) * ew
    ph = jnp.exp(dh) * eh
    refined = jnp.stack([pcx - 0.5 * pw, pcy - 0.5 * ph,
                         pcx + 0.5 * pw, pcy + 0.5 * ph], axis=1)

    d = bbox_pred - targets
    ad = jnp.abs(d)
    per = jnp.where(ad < 1.0, 0.5 * d * d, ad - 0.5)
    loss = jnp.where(mask, jnp.sum(per, axis=1), 0.0)
    return loss, refined, mask, jnp.sum(mask.astype(jnp.int32))


def _check(rois, bbox_pred, gt_box, thr, tile_n):
    loss, refined, mask, num_pos, num_rois = ubr_smooth_l1_loss(
        rois, bbox_pred, gt_box, thr, tile_n=tile_n)
    loss, refined, mask, num_pos = jax.block_until_ready(
        (loss, refined, mask, num_pos))
    r_loss, r_refined, r_mask, r_count = _reference(
        rois.astype(jnp.float32), bbox_pred.astype(jnp.float32),
        gt_box.astype(jnp.float32), thr)
    assert num_rois == rois.shape[0]
    assert bool(jnp.all(mask == r_mask))
    assert int(num_pos) == int(r_count)
    assert bool(jnp.allclose(loss, r_loss, rtol=1e-5, atol=1e-5))
    assert bool(jnp.allclose(refined, r_refined, rtol=1e-5, atol=1e-4))
    return int(num_pos)


if __name__ == "__main__":
    key = jax.random.PRNGKey(0)
    k1, k2, k3, k4, k5, k6, k7 = jax.random.split(key, 7)

    overlap_threshold = 0.5
    G = 4

    # Deterministic gt boxes with positive area.
    gt_xy = jax.random.uniform(k1, (G, 2), minval=0.0, maxval=40.0)
    gt_wh = jax.random.uniform(k2, (G, 2), minval=10.0, maxval=30.0)
    gt_box = jnp.concatenate([gt_xy, gt_xy + gt_wh], axis=1)          # [G, 4]

    # ---- test 1: tiny N=8 (first G rois near gt -> guaranteed positives) ----
    N1 = 8
    jitter = jax.random.uniform(k3, (G, 4), minval=-1.0, maxval=1.0)
    near = gt_box + jitter
    far_xy = jax.random.uniform(k4, (N1 - G, 2), minval=60.0, maxval=90.0)
    far = jnp.concatenate([far_xy, far_xy + 8.0], axis=1)
    rois1 = jnp.concatenate([near, far], axis=0)                      # [N1, 4]
    pred1 = 0.1 * jax.random.normal(jax.random.PRNGKey(1), (N1, 4))
    npos1 = _check(rois1, pred1, gt_box, overlap_threshold, tile_n=None)
    assert npos1 > 0

    # ---- test 2: N=2500, auto tile (2 grid steps) and explicit 1024 tile ----
    N2 = 2500
    rnd_xy = jax.random.uniform(k5, (N2 - G, 2), minval=0.0, maxval=80.0)
    rnd_wh = jax.random.uniform(k6, (N2 - G, 2), minval=5.0, maxval=40.0)
    rois2 = jnp.concatenate(
        [gt_box + 0.5 * jax.random.normal(k7, (G, 4)),
         jnp.concatenate([rnd_xy, rnd_xy + rnd_wh], axis=1)], axis=0)  # [N2, 4]
    pred2 = 0.1 * jax.random.normal(jax.random.PRNGKey(2), (N2, 4))
    npos2 = _check(rois2, pred2, gt_box, overlap_threshold, tile_n=None)
    assert npos2 > 0
    npos3 = _check(rois2, pred2, gt_box, overlap_threshold, tile_n=1024)
    assert npos3 == npos2

    print("KERNEL_OK")
</pallas_src>

<mosaic_0001>
module attributes {stable_mosaic.version = 11 : i64} {
  func.func @_ubr_smooth_l1_kernel(%arg0: i32, %arg1: memref<4x4xf32, #tpu.memory_space<smem>>, %arg2: memref<4x8x128xf32, #tpu.memory_space<vmem>>, %arg3: memref<4x8x128xf32, #tpu.memory_space<vmem>>, %arg4: memref<8x8x128xf32, #tpu.memory_space<vmem>>) attributes {dimension_semantics = [#tpu.dimension_semantics<parallel>], iteration_bounds = array<i64: 1>, scalar_prefetch = 0 : i64, scratch_operands = 0 : i64, tpu.core_type = #tpu.core_type<tc>, window_params = [{transform_indices = @transform_0, window_bounds = array<i64: 4, 4>}, {transform_indices = @transform_1, window_bounds = array<i64: 4, 8, 128>}, {transform_indices = @transform_2, window_bounds = array<i64: 4, 8, 128>}, {transform_indices = @transform_3, window_bounds = array<i64: 8, 8, 128>}]} {
    %c0 = arith.constant 0 : index
    %c0_0 = arith.constant 0 : index
    %c0_1 = arith.constant 0 : index
    %0 = vector.load %arg2[%c0, %c0_0, %c0_1] : memref<4x8x128xf32, #tpu.memory_space<vmem>>, vector<1x8x128xf32>
    %1 = vector.shape_cast %0 : vector<1x8x128xf32> to vector<8x128xf32>
    %c1 = arith.constant 1 : index
    %c0_2 = arith.constant 0 : index
    %c0_3 = arith.constant 0 : index
    %2 = vector.load %arg2[%c1, %c0_2, %c0_3] : memref<4x8x128xf32, #tpu.memory_space<vmem>>, vector<1x8x128xf32>
    %3 = vector.shape_cast %2 : vector<1x8x128xf32> to vector<8x128xf32>
    %c2 = arith.constant 2 : index
    %c0_4 = arith.constant 0 : index
    %c0_5 = arith.constant 0 : index
    %4 = vector.load %arg2[%c2, %c0_4, %c0_5] : memref<4x8x128xf32, #tpu.memory_space<vmem>>, vector<1x8x128xf32>
    %5 = vector.shape_cast %4 : vector<1x8x128xf32> to vector<8x128xf32>
    %c3 = arith.constant 3 : index
    %c0_6 = arith.constant 0 : index
    %c0_7 = arith.constant 0 : index
    %6 = vector.load %arg2[%c3, %c0_6, %c0_7] : memref<4x8x128xf32, #tpu.memory_space<vmem>>, vector<1x8x128xf32>
    %7 = vector.shape_cast %6 : vector<1x8x128xf32> to vector<8x128xf32>
    %8 = arith.subf %5, %1 : vector<8x128xf32>
    %9 = arith.subf %7, %3 : vector<8x128xf32>
    %10 = arith.mulf %8, %9 : vector<8x128xf32>
    %c0_8 = arith.constant 0 : index
    %c0_9 = arith.constant 0 : index
    %11 = memref.load %arg1[%c0_8, %c0_9] : memref<4x4xf32, #tpu.memory_space<smem>>
    %c0_10 = arith.constant 0 : index
    %c1_11 = arith.constant 1 : index
    %12 = memref.load %arg1[%c0_10, %c1_11] : memref<4x4xf32, #tpu.memory_space<smem>>
    %c0_12 = arith.constant 0 : index
    %c2_13 = arith.constant 2 : index
    %13 = memref.load %arg1[%c0_12, %c2_13] : memref<4x4xf32, #tpu.memory_space<smem>>
    %c0_14 = arith.constant 0 : index
    %c3_15 = arith.constant 3 : index
    %14 = memref.load %arg1[%c0_14, %c3_15] : memref<4x4xf32, #tpu.memory_space<smem>>
    %15 = vector.broadcast %13 : f32 to vector<8x128xf32>
    %16 = arith.minimumf %5, %15 : vector<8x128xf32>
    %17 = vector.broadcast %11 : f32 to vector<8x128xf32>
    %18 = arith.maximumf %1, %17 : vector<8x128xf32>
    %19 = arith.subf %16, %18 : vector<8x128xf32>
    %cst = arith.constant 0.000000e+00 : f32
    %20 = vector.broadcast %cst : f32 to vector<8x128xf32>
    %21 = arith.maximumf %19, %20 : vector<8x128xf32>
    %22 = vector.broadcast %14 : f32 to vector<8x128xf32>
    %23 = arith.minimumf %7, %22 : vector<8x128xf32>
    %24 = vector.broadcast %12 : f32 to vector<8x128xf32>
    %25 = arith.maximumf %3, %24 : vector<8x128xf32>
    %26 = arith.subf %23, %25 : vector<8x128xf32>
    %cst_16 = arith.constant 0.000000e+00 : f32
    %27 = vector.broadcast %cst_16 : f32 to vector<8x128xf32>
    %28 = arith.maximumf %26, %27 : vector<8x128xf32>
    %29 = arith.mulf %21, %28 : vector<8x128xf32>
    %30 = arith.subf %13, %11 : f32
    %31 = arith.subf %14, %12 : f32
    %32 = arith.mulf %30, %31 : f32
    %33 = vector.broadcast %32 : f32 to vector<8x128xf32>
    %34 = arith.addf %10, %33 : vector<8x128xf32>
    %35 = arith.subf %34, %29 : vector<8x128xf32>
    %36 = arith.divf %29, %35 : vector<8x128xf32>
    %cst_17 = arith.constant 0.000000e+00 : f32
    %37 = vector.broadcast %cst_17 : f32 to vector<8x128xf32>
    %c1_18 = arith.constant 1 : index
    %c0_19 = arith.constant 0 : index
    %38 = memref.load %arg1[%c1_18, %c0_19] : memref<4x4xf32, #tpu.memory_space<smem>>
    %c1_20 = arith.constant 1 : index
    %c1_21 = arith.constant 1 : index
    %39 = memref.load %arg1[%c1_20, %c1_21] : memref<4x4xf32, #tpu.memory_space<smem>>
    %c1_22 = arith.constant 1 : index
    %c2_23 = arith.constant 2 : index
    %40 = memref.load %arg1[%c1_22, %c2_23] : memref<4x4xf32, #tpu.memory_space<smem>>
    %c1_24 = arith.constant 1 : index
    %c3_25 = arith.constant 3 : index
    %41 = memref.load %arg1[%c1_24, %c3_25] : memref<4x4xf32, #tpu.memory_space<smem>>
    %42 = vector.broadcast %40 : f32 to vector<8x128xf32>
    %43 = arith.minimumf %5, %42 : vector<8x128xf32>
    %44 = vector.broadcast %38 : f32 to vector<8x128xf32>
    %45 = arith.maximumf %1, %44 : vector<8x128xf32>
    %46 = arith.subf %43, %45 : vector<8x128xf32>
    %cst_26 = arith.constant 0.000000e+00 : f32
    %47 = vector.broadcast %cst_26 : f32 to vector<8x128xf32>
    %48 = arith.maximumf %46, %47 : vector<8x128xf32>
    %49 = vector.broadcast %41 : f32 to vector<8x128xf32>
    %50 = arith.minimumf %7, %49 : vector<8x128xf32>
    %51 = vector.broadcast %39 : f32 to vector<8x128xf32>
    %52 = arith.maximumf %3, %51 : vector<8x128xf32>
    %53 = arith.subf %50, %52 : vector<8x128xf32>
    %cst_27 = arith.constant 0.000000e+00 : f32
    %54 = vector.broadcast %cst_27 : f32 to vector<8x128xf32>
    %55 = arith.maximumf %53, %54 : vector<8x128xf32>
    %56 = arith.mulf %48, %55 : vector<8x128xf32>
    %57 = arith.subf %40, %38 : f32
    %58 = arith.subf %41, %39 : f32
    %59 = arith.mulf %57, %58 : f32
    %60 = vector.broadcast %59 : f32 to vector<8x128xf32>
    %61 = arith.addf %10, %60 : vector<8x128xf32>
    %62 = arith.subf %61, %56 : vector<8x128xf32>
    %63 = arith.divf %56, %62 : vector<8x128xf32>
    %64 = arith.cmpf ogt, %63, %36 : vector<8x128xf32>
    %65 = arith.select %64, %63, %36 : vector<8x128xi1>, vector<8x128xf32>
    %cst_28 = arith.constant 1.000000e+00 : f32
    %66 = vector.broadcast %cst_28 : f32 to vector<8x128xf32>
    %67 = arith.select %64, %66, %37 : vector<8x128xi1>, vector<8x128xf32>
    %68 = vector.broadcast %38 : f32 to vector<8x128xf32>
    %69 = vector.broadcast %11 : f32 to vector<8x128xf32>
    %70 = arith.select %64, %68, %69 : vector<8x128xi1>, vector<8x128xf32>
    %71 = vector.broadcast %39 : f32 to vector<8x128xf32>
    %72 = vector.broadcast %12 : f32 to vector<8x128xf32>
    %73 = arith.select %64, %71, %72 : vector<8x128xi1>, vector<8x128xf32>
    %74 = vector.broadcast %40 : f32 to vector<8x128xf32>
    %75 = vector.broadcast %13 : f32 to vector<8x128xf32>
    %76 = arith.select %64, %74, %75 : vector<8x128xi1>, vector<8x128xf32>
    %77 = vector.broadcast %41 : f32 to vector<8x128xf32>
    %78 = vector.broadcast %14 : f32 to vector<8x128xf32>
    %79 = arith.select %64, %77, %78 : vector<8x128xi1>, vector<8x128xf32>
    %c2_29 = arith.constant 2 : index
    %c0_30 = arith.constant 0 : index
    %80 = memref.load %arg1[%c2_29, %c0_30] : memref<4x4xf32, #tpu.memory_space<smem>>
    %c2_31 = arith.constant 2 : index
    %c1_32 = arith.constant 1 : index
    %81 = memref.load %arg1[%c2_31, %c1_32] : memref<4x4xf32, #tpu.memory_space<smem>>
    %c2_33 = arith.constant 2 : index
    %c2_34 = arith.constant 2 : index
    %82 = memref.load %arg1[%c2_33, %c2_34] : memref<4x4xf32, #tpu.memory_space<smem>>
    %c2_35 = arith.constant 2 : index
    %c3_36 = arith.constant 3 : index
    %83 = memref.load %arg1[%c2_35, %c3_36] : memref<4x4xf32, #tpu.memory_space<smem>>
    %84 = vector.broadcast %82 : f32 to vector<8x128xf32>
    %85 = arith.minimumf %5, %84 : vector<8x128xf32>
    %86 = vector.broadcast %80 : f32 to vector<8x128xf32>
    %87 = arith.maximumf %1, %86 : vector<8x128xf32>
    %88 = arith.subf %85, %87 : vector<8x128xf32>
    %cst_37 = arith.constant 0.000000e+00 : f32
    %89 = vector.broadcast %cst_37 : f32 to vector<8x128xf32>
    %90 = arith.maximumf %88, %89 : vector<8x128xf32>
    %91 = vector.broadcast %83 : f32 to vector<8x128xf32>
    %92 = arith.minimumf %7, %91 : vector<8x128xf32>
    %93 = vector.broadcast %81 : f32 to vector<8x128xf32>
    %94 = arith.maximumf %3, %93 : vector<8x128xf32>
    %95 = arith.subf %92, %94 : vector<8x128xf32>
    %cst_38 = arith.constant 0.000000e+00 : f32
    %96 = vector.broadcast %cst_38 : f32 to vector<8x128xf32>
    %97 = arith.maximumf %95, %96 : vector<8x128xf32>
    %98 = arith.mulf %90, %97 : vector<8x128xf32>
    %99 = arith.subf %82, %80 : f32
    %100 = arith.subf %83, %81 : f32
    %101 = arith.mulf %99, %100 : f32
    %102 = vector.broadcast %101 : f32 to vector<8x128xf32>
    %103 = arith.addf %10, %102 : vector<8x128xf32>
    %104 = arith.subf %103, %98 : vector<8x128xf32>
    %105 = arith.divf %98, %104 : vector<8x128xf32>
    %106 = arith.cmpf ogt, %105, %65 : vector<8x128xf32>
    %107 = arith.select %106, %105, %65 : vector<8x128xi1>, vector<8x128xf32>
    %cst_39 = arith.constant 2.000000e+00 : f32
    %108 = vector.broadcast %cst_39 : f32 to vector<8x128xf32>
    %109 = arith.select %106, %108, %67 : vector<8x128xi1>, vector<8x128xf32>
    %110 = vector.broadcast %80 : f32 to vector<8x128xf32>
    %111 = arith.select %106, %110, %70 : vector<8x128xi1>, vector<8x128xf32>
    %112 = vector.broadcast %81 : f32 to vector<8x128xf32>
    %113 = arith.select %106, %112, %73 : vector<8x128xi1>, vector<8x128xf32>
    %114 = vector.broadcast %82 : f32 to vector<8x128xf32>
    %115 = arith.select %106, %114, %76 : vector<8x128xi1>, vector<8x128xf32>
    %116 = vector.broadcast %83 : f32 to vector<8x128xf32>
    %117 = arith.select %106, %116, %79 : vector<8x128xi1>, vector<8x128xf32>
    %c3_40 = arith.constant 3 : index
    %c0_41 = arith.constant 0 : index
    %118 = memref.load %arg1[%c3_40, %c0_41] : memref<4x4xf32, #tpu.memory_space<smem>>
    %c3_42 = arith.constant 3 : index
    %c1_43 = arith.constant 1 : index
    %119 = memref.load %arg1[%c3_42, %c1_43] : memref<4x4xf32, #tpu.memory_space<smem>>
    %c3_44 = arith.constant 3 : index
    %c2_45 = arith.constant 2 : index
    %120 = memref.load %arg1[%c3_44, %c2_45] : memref<4x4xf32, #tpu.memory_space<smem>>
    %c3_46 = arith.constant 3 : index
    %c3_47 = arith.constant 3 : index
    %121 = memref.load %arg1[%c3_46, %c3_47] : memref<4x4xf32, #tpu.memory_space<smem>>
    %122 = vector.broadcast %120 : f32 to vector<8x128xf32>
    %123 = arith.minimumf %5, %122 : vector<8x128xf32>
    %124 = vector.broadcast %118 : f32 to vector<8x128xf32>
    %125 = arith.maximumf %1, %124 : vector<8x128xf32>
    %126 = arith.subf %123, %125 : vector<8x128xf32>
    %cst_48 = arith.constant 0.000000e+00 : f32
    %127 = vector.broadcast %cst_48 : f32 to vector<8x128xf32>
    %128 = arith.maximumf %126, %127 : vector<8x128xf32>
    %129 = vector.broadcast %121 : f32 to vector<8x128xf32>
    %130 = arith.minimumf %7, %129 : vector<8x128xf32>
    %131 = vector.broadcast %119 : f32 to vector<8x128xf32>
    %132 = arith.maximumf %3, %131 : vector<8x128xf32>
    %133 = arith.subf %130, %132 : vector<8x128xf32>
    %cst_49 = arith.constant 0.000000e+00 : f32
    %134 = vector.broadcast %cst_49 : f32 to vector<8x128xf32>
    %135 = arith.maximumf %133, %134 : vector<8x128xf32>
    %136 = arith.mulf %128, %135 : vector<8x128xf32>
    %137 = arith.subf %120, %118 : f32
    %138 = arith.subf %121, %119 : f32
    %139 = arith.mulf %137, %138 : f32
    %140 = vector.broadcast %139 : f32 to vector<8x128xf32>
    %141 = arith.addf %10, %140 : vector<8x128xf32>
    %142 = arith.subf %141, %136 : vector<8x128xf32>
    %143 = arith.divf %136, %142 : vector<8x128xf32>
    %144 = arith.cmpf ogt, %143, %107 : vector<8x128xf32>
    %145 = arith.select %144, %143, %107 : vector<8x128xi1>, vector<8x128xf32>
    %cst_50 = arith.constant 3.000000e+00 : f32
    %146 = vector.broadcast %cst_50 : f32 to vector<8x128xf32>
    %147 = arith.select %144, %146, %109 : vector<8x128xi1>, vector<8x128xf32>
    %148 = vector.broadcast %118 : f32 to vector<8x128xf32>
    %149 = arith.select %144, %148, %111 : vector<8x128xi1>, vector<8x128xf32>
    %150 = vector.broadcast %119 : f32 to vector<8x128xf32>
    %151 = arith.select %144, %150, %113 : vector<8x128xi1>, vector<8x128xf32>
    %152 = vector.broadcast %120 : f32 to vector<8x128xf32>
    %153 = arith.select %144, %152, %115 : vector<8x128xi1>, vector<8x128xf32>
    %154 = vector.broadcast %121 : f32 to vector<8x128xf32>
    %155 = arith.select %144, %154, %117 : vector<8x128xi1>, vector<8x128xf32>
    %cst_51 = arith.constant 5.000000e-01 : f32
    %156 = vector.broadcast %cst_51 : f32 to vector<8x128xf32>
    %157 = arith.cmpf ogt, %145, %156 : vector<8x128xf32>
    %158 = arith.subf %5, %1 : vector<8x128xf32>
    %cst_52 = arith.constant 1.000000e+00 : f32
    %159 = vector.broadcast %cst_52 : f32 to vector<8x128xf32>
    %160 = arith.addf %158, %159 : vector<8x128xf32>
    %161 = arith.subf %7, %3 : vector<8x128xf32>
    %cst_53 = arith.constant 1.000000e+00 : f32
    %162 = vector.broadcast %cst_53 : f32 to vector<8x128xf32>
    %163 = arith.addf %161, %162 : vector<8x128xf32>
    %cst_54 = arith.constant 5.000000e-01 : f32
    %164 = vector.broadcast %cst_54 : f32 to vector<8x128xf32>
    %165 = arith.mulf %164, %160 : vector<8x128xf32>
    %166 = arith.addf %1, %165 : vector<8x128xf32>
    %cst_55 = arith.constant 5.000000e-01 : f32
    %167 = vector.broadcast %cst_55 : f32 to vector<8x128xf32>
    %168 = arith.mulf %167, %163 : vector<8x128xf32>
    %169 = arith.addf %3, %168 : vector<8x128xf32>
    %170 = arith.subf %153, %149 : vector<8x128xf32>
    %cst_56 = arith.constant 1.000000e+00 : f32
    %171 = vector.broadcast %cst_56 : f32 to vector<8x128xf32>
    %172 = arith.addf %170, %171 : vector<8x128xf32>
    %173 = arith.subf %155, %151 : vector<8x128xf32>
    %cst_57 = arith.constant 1.000000e+00 : f32
    %174 = vector.broadcast %cst_57 : f32 to vector<8x128xf32>
    %175 = arith.addf %173, %174 : vector<8x128xf32>
    %cst_58 = arith.constant 5.000000e-01 : f32
    %176 = vector.broadcast %cst_58 : f32 to vector<8x128xf32>
    %177 = arith.mulf %176, %172 : vector<8x128xf32>
    %178 = arith.addf %149, %177 : vector<8x128xf32>
    %cst_59 = arith.constant 5.000000e-01 : f32
    %179 = vector.broadcast %cst_59 : f32 to vector<8x128xf32>
    %180 = arith.mulf %179, %175 : vector<8x128xf32>
    %181 = arith.addf %151, %180 : vector<8x128xf32>
    %182 = arith.subf %178, %166 : vector<8x128xf32>
    %183 = arith.divf %182, %160 : vector<8x128xf32>
    %184 = arith.subf %181, %169 : vector<8x128xf32>
    %185 = arith.divf %184, %163 : vector<8x128xf32>
    %186 = arith.divf %172, %160 : vector<8x128xf32>
    %187 = math.log %186 : vector<8x128xf32>
    %188 = arith.divf %175, %163 : vector<8x128xf32>
    %189 = math.log %188 : vector<8x128xf32>
    %c0_60 = arith.constant 0 : index
    %c0_61 = arith.constant 0 : index
    %c0_62 = arith.constant 0 : index
    %190 = vector.load %arg3[%c0_60, %c0_61, %c0_62] : memref<4x8x128xf32, #tpu.memory_space<vmem>>, vector<1x8x128xf32>
    %191 = vector.shape_cast %190 : vector<1x8x128xf32> to vector<8x128xf32>
    %c1_63 = arith.constant 1 : index
    %c0_64 = arith.constant 0 : index
    %c0_65 = arith.constant 0 : index
    %192 = vector.load %arg3[%c1_63, %c0_64, %c0_65] : memref<4x8x128xf32, #tpu.memory_space<vmem>>, vector<1x8x128xf32>
    %193 = vector.shape_cast %192 : vector<1x8x128xf32> to vector<8x128xf32>
    %c2_66 = arith.constant 2 : index
    %c0_67 = arith.constant 0 : index
    %c0_68 = arith.constant 0 : index
    %194 = vector.load %arg3[%c2_66, %c0_67, %c0_68] : memref<4x8x128xf32, #tpu.memory_space<vmem>>, vector<1x8x128xf32>
    %195 = vector.shape_cast %194 : vector<1x8x128xf32> to vector<8x128xf32>
    %c3_69 = arith.constant 3 : index
    %c0_70 = arith.constant 0 : index
    %c0_71 = arith.constant 0 : index
    %196 = vector.load %arg3[%c3_69, %c0_70, %c0_71] : memref<4x8x128xf32, #tpu.memory_space<vmem>>, vector<1x8x128xf32>
    %197 = vector.shape_cast %196 : vector<1x8x128xf32> to vector<8x128xf32>
    %198 = arith.mulf %191, %160 : vector<8x128xf32>
    %199 = arith.addf %198, %166 : vector<8x128xf32>
    %200 = arith.mulf %193, %163 : vector<8x128xf32>
    %201 = arith.addf %200, %169 : vector<8x128xf32>
    %202 = math.exp %195 : vector<8x128xf32>
    %203 = arith.mulf %202, %160 : vector<8x128xf32>
    %204 = math.exp %197 : vector<8x128xf32>
    %205 = arith.mulf %204, %163 : vector<8x128xf32>
    %206 = arith.subf %191, %183 : vector<8x128xf32>
    %207 = math.absf %206 : vector<8x128xf32>
    %cst_72 = arith.constant 1.000000e+00 : f32
    %208 = vector.broadcast %cst_72 : f32 to vector<8x128xf32>
    %209 = arith.cmpf olt, %207, %208 : vector<8x128xf32>
    %cst_73 = arith.constant 5.000000e-01 : f32
    %210 = vector.broadcast %cst_73 : f32 to vector<8x128xf32>
    %211 = arith.mulf %210, %206 : vector<8x128xf32>
    %212 = arith.mulf %211, %206 : vector<8x128xf32>
    %cst_74 = arith.constant 5.000000e-01 : f32
    %213 = vector.broadcast %cst_74 : f32 to vector<8x128xf32>
    %214 = arith.subf %207, %213 : vector<8x128xf32>
    %215 = arith.select %209, %212, %214 : vector<8x128xi1>, vector<8x128xf32>
    %216 = arith.subf %193, %185 : vector<8x128xf32>
    %217 = math.absf %216 : vector<8x128xf32>
    %cst_75 = arith.constant 1.000000e+00 : f32
    %218 = vector.broadcast %cst_75 : f32 to vector<8x128xf32>
    %219 = arith.cmpf olt, %217, %218 : vector<8x128xf32>
    %cst_76 = arith.constant 5.000000e-01 : f32
    %220 = vector.broadcast %cst_76 : f32 to vector<8x128xf32>
    %221 = arith.mulf %220, %216 : vector<8x128xf32>
    %222 = arith.mulf %221, %216 : vector<8x128xf32>
    %cst_77 = arith.constant 5.000000e-01 : f32
    %223 = vector.broadcast %cst_77 : f32 to vector<8x128xf32>
    %224 = arith.subf %217, %223 : vector<8x128xf32>
    %225 = arith.select %219, %222, %224 : vector<8x128xi1>, vector<8x128xf32>
    %226 = arith.addf %215, %225 : vector<8x128xf32>
    %227 = arith.subf %195, %187 : vector<8x128xf32>
    %228 = math.absf %227 : vector<8x128xf32>
    %cst_78 = arith.constant 1.000000e+00 : f32
    %229 = vector.broadcast %cst_78 : f32 to vector<8x128xf32>
    %230 = arith.cmpf olt, %228, %229 : vector<8x128xf32>
    %cst_79 = arith.constant 5.000000e-01 : f32
    %231 = vector.broadcast %cst_79 : f32 to vector<8x128xf32>
    %232 = arith.mulf %231, %227 : vector<8x128xf32>
    %233 = arith.mulf %232, %227 : vector<8x128xf32>
    %cst_80 = arith.constant 5.000000e-01 : f32
    %234 = vector.broadcast %cst_80 : f32 to vector<8x128xf32>
    %235 = arith.subf %228, %234 : vector<8x128xf32>
    %236 = arith.select %230, %233, %235 : vector<8x128xi1>, vector<8x128xf32>
    %237 = arith.addf %226, %236 : vector<8x128xf32>
    %238 = arith.subf %197, %189 : vector<8x128xf32>
    %239 = math.absf %238 : vector<8x128xf32>
    %cst_81 = arith.constant 1.000000e+00 : f32
    %240 = vector.broadcast %cst_81 : f32 to vector<8x128xf32>
    %241 = arith.cmpf olt, %239, %240 : vector<8x128xf32>
    %cst_82 = arith.constant 5.000000e-01 : f32
    %242 = vector.broadcast %cst_82 : f32 to vector<8x128xf32>
    %243 = arith.mulf %242, %238 : vector<8x128xf32>
    %244 = arith.mulf %243, %238 : vector<8x128xf32>
    %cst_83 = arith.constant 5.000000e-01 : f32
    %245 = vector.broadcast %cst_83 : f32 to vector<8x128xf32>
    %246 = arith.subf %239, %245 : vector<8x128xf32>
    %247 = arith.select %241, %244, %246 : vector<8x128xi1>, vector<8x128xf32>
    %248 = arith.addf %237, %247 : vector<8x128xf32>
    %cst_84 = arith.constant 0.000000e+00 : f32
    %249 = vector.broadcast %cst_84 : f32 to vector<8x128xf32>
    %250 = arith.select %157, %248, %249 : vector<8x128xi1>, vector<8x128xf32>
    %c0_85 = arith.constant 0 : index
    %c0_86 = arith.constant 0 : index
    %c0_87 = arith.constant 0 : index
    %251 = vector.load %arg4[%c0_85, %c0_86, %c0_87] : memref<8x8x128xf32, #tpu.memory_space<vmem>>, vector<1x8x128xf32>
    %252 = vector.shape_cast %251 : vector<1x8x128xf32> to vector<8x128xf32>
    %253 = vector.shape_cast %250 : vector<8x128xf32> to vector<1x8x128xf32>
    tpu.vector_store %arg4[%c0_85, %c0_86, %c0_87], %253 {strides = array<i32>} : memref<8x8x128xf32, #tpu.memory_space<vmem>>, vector<1x8x128xf32>,
    %254 = arith.extui %157 : vector<8x128xi1> to vector<8x128xi32>
    %255 = arith.sitofp %254 : vector<8x128xi32> to vector<8x128xf32>
    %c1_88 = arith.constant 1 : index
    %c0_89 = arith.constant 0 : index
    %c0_90 = arith.constant 0 : index
    %256 = vector.load %arg4[%c1_88, %c0_89, %c0_90] : memref<8x8x128xf32, #tpu.memory_space<vmem>>, vector<1x8x128xf32>
    %257 = vector.shape_cast %256 : vector<1x8x128xf32> to vector<8x128xf32>
    %258 = vector.shape_cast %255 : vector<8x128xf32> to vector<1x8x128xf32>
    tpu.vector_store %arg4[%c1_88, %c0_89, %c0_90], %258 {strides = array<i32>} : memref<8x8x128xf32, #tpu.memory_space<vmem>>, vector<1x8x128xf32>,
    %cst_91 = arith.constant 5.000000e-01 : f32
    %259 = vector.broadcast %cst_91 : f32 to vector<8x128xf32>
    %260 = arith.mulf %259, %203 : vector<8x128xf32>
    %261 = arith.subf %199, %260 : vector<8x128xf32>
    %c2_92 = arith.constant 2 : index
    %c0_93 = arith.constant 0 : index
    %c0_94 = arith.constant 0 : index
    %262 = vector.load %arg4[%c2_92, %c0_93, %c0_94] : memref<8x8x128xf32, #tpu.memory_space<vmem>>, vector<1x8x128xf32>
    %263 = vector.shape_cast %262 : vector<1x8x128xf32> to vector<8x128xf32>
    %264 = vector.shape_cast %261 : vector<8x128xf32> to vector<1x8x128xf32>
    tpu.vector_store %arg4[%c2_92, %c0_93, %c0_94], %264 {strides = array<i32>} : memref<8x8x128xf32, #tpu.memory_space<vmem>>, vector<1x8x128xf32>,
    %cst_95 = arith.constant 5.000000e-01 : f32
    %265 = vector.broadcast %cst_95 : f32 to vector<8x128xf32>
    %266 = arith.mulf %265, %205 : vector<8x128xf32>
    %267 = arith.subf %201, %266 : vector<8x128xf32>
    %c3_96 = arith.constant 3 : index
    %c0_97 = arith.constant 0 : index
    %c0_98 = arith.constant 0 : index
    %268 = vector.load %arg4[%c3_96, %c0_97, %c0_98] : memref<8x8x128xf32, #tpu.memory_space<vmem>>, vector<1x8x128xf32>
    %269 = vector.shape_cast %268 : vector<1x8x128xf32> to vector<8x128xf32>
    %270 = vector.shape_cast %267 : vector<8x128xf32> to vector<1x8x128xf32>
    tpu.vector_store %arg4[%c3_96, %c0_97, %c0_98], %270 {strides = array<i32>} : memref<8x8x128xf32, #tpu.memory_space<vmem>>, vector<1x8x128xf32>,
    %cst_99 = arith.constant 5.000000e-01 : f32
    %271 = vector.broadcast %cst_99 : f32 to vector<8x128xf32>
    %272 = arith.mulf %271, %203 : vector<8x128xf32>
    %273 = arith.addf %199, %272 : vector<8x128xf32>
    %c4 = arith.constant 4 : index
    %c0_100 = arith.constant 0 : index
    %c0_101 = arith.constant 0 : index
    %274 = vector.load %arg4[%c4, %c0_100, %c0_101] : memref<8x8x128xf32, #tpu.memory_space<vmem>>, vector<1x8x128xf32>
    %275 = vector.shape_cast %274 : vector<1x8x128xf32> to vector<8x128xf32>
    %276 = vector.shape_cast %273 : vector<8x128xf32> to vector<1x8x128xf32>
    tpu.vector_store %arg4[%c4, %c0_100, %c0_101], %276 {strides = array<i32>} : memref<8x8x128xf32, #tpu.memory_space<vmem>>, vector<1x8x128xf32>,
    %cst_102 = arith.constant 5.000000e-01 : f32
    %277 = vector.broadcast %cst_102 : f32 to vector<8x128xf32>
    %278 = arith.mulf %277, %205 : vector<8x128xf32>
    %279 = arith.addf %201, %278 : vector<8x128xf32>
    %c5 = arith.constant 5 : index
    %c0_103 = arith.constant 0 : index
    %c0_104 = arith.constant 0 : index
    %280 = vector.load %arg4[%c5, %c0_103, %c0_104] : memref<8x8x128xf32, #tpu.memory_space<vmem>>, vector<1x8x128xf32>
    %281 = vector.shape_cast %280 : vector<1x8x128xf32> to vector<8x128xf32>
    %282 = vector.shape_cast %279 : vector<8x128xf32> to vector<1x8x128xf32>
    tpu.vector_store %arg4[%c5, %c0_103, %c0_104], %282 {strides = array<i32>} : memref<8x8x128xf32, #tpu.memory_space<vmem>>, vector<1x8x128xf32>,
    %c6 = arith.constant 6 : index
    %c0_105 = arith.constant 0 : index
    %c0_106 = arith.constant 0 : index
    %283 = vector.load %arg4[%c6, %c0_105, %c0_106] : memref<8x8x128xf32, #tpu.memory_space<vmem>>, vector<1x8x128xf32>
    %284 = vector.shape_cast %283 : vector<1x8x128xf32> to vector<8x128xf32>
    %285 = vector.shape_cast %145 : vector<8x128xf32> to vector<1x8x128xf32>
    tpu.vector_store %arg4[%c6, %c0_105, %c0_106], %285 {strides = array<i32>} : memref<8x8x128xf32, #tpu.memory_space<vmem>>, vector<1x8x128xf32>,
    %c7 = arith.constant 7 : index
    %c0_107 = arith.constant 0 : index
    %c0_108 = arith.constant 0 : index
    %286 = vector.load %arg4[%c7, %c0_107, %c0_108] : memref<8x8x128xf32, #tpu.memory_space<vmem>>, vector<1x8x128xf32>
    %287 = vector.shape_cast %286 : vector<1x8x128xf32> to vector<8x128xf32>
    %288 = vector.shape_cast %147 : vector<8x128xf32> to vector<1x8x128xf32>
    tpu.vector_store %arg4[%c7, %c0_107, %c0_108], %288 {strides = array<i32>} : memref<8x8x128xf32, #tpu.memory_space<vmem>>, vector<1x8x128xf32>,
    return
  }
  func.func @transform_0(%arg0: i32) -> (i32, i32) {
    %c0_i32 = arith.constant 0 : i32
    %c0_i32_0 = arith.constant 0 : i32
    %c0_i32_1 = arith.constant 0 : i32
    return %c0_i32, %c0_i32_0 : i32, i32
  }
  func.func @transform_1(%arg0: i32) -> (i32, i32, i32) {
    %c0_i32 = arith.constant 0 : i32
    %c0_i32_0 = arith.constant 0 : i32
    %c0_i32_1 = arith.constant 0 : i32
    return %c0_i32, %arg0, %c0_i32_0 : i32, i32, i32
  }
  func.func @transform_2(%arg0: i32) -> (i32, i32, i32) {
    %c0_i32 = arith.constant 0 : i32
    %c0_i32_0 = arith.constant 0 : i32
    %c0_i32_1 = arith.constant 0 : i32
    return %c0_i32, %arg0, %c0_i32_0 : i32, i32, i32
  }
  func.func @transform_3(%arg0: i32) -> (i32, i32, i32) {
    %c0_i32 = arith.constant 0 : i32
    %c0_i32_0 = arith.constant 0 : i32
    %c0_i32_1 = arith.constant 0 : i32
    return %c0_i32, %arg0, %c0_i32_0 : i32, i32, i32
  }
}

</mosaic_0001>

<bundles_post_ra>
// kernel: tpu_custom_call.1
= control target key start
LH: loop header
LB: loop body
LE: loop exit
PB: predicated region body
PF: predicated region fallthrough
CT: control target
= control target key end

     0   :  { %8 = vsyncpa [#allocation5], 0  ;;  %s754_s0 = inlined_call_operand.hbm [shape: f32[4,4], index: 0, kind: input, shape index: {}]   ;;  %s755_s1 = inlined_call_operand.hbm [shape: f32[4,8,128], index: 1, kind: input, shape index: {}]   ;;  %s756_s2 = inlined_call_operand.hbm [shape: f32[4,8,128], index: 2, kind: input, shape index: {}]   ;;  %s757_s3 = inlined_call_operand.hbm [shape: f32[8,8,128], index: 3, kind: output, shape index: {}]  }
   0x1   :  { %9 = vsyncpa [#allocation3], 0 }
   0x2   :  { %10 = vsyncpa [#allocation8], 0 }
   0x3   :  { %11 = vsyncpa [#allocation4], 0  ;;  %s350_s14 = scalar_lea.hbm %s754_s0, 64 }
   0x4   :  { %p351_p0 = scmp.ne.s32.totalorder %s754_s0, %s350_s14  ;;  %p354_p1 = scmp.lt.u32.totalorder %s350_s14, %s754_s0 }
   0x6   :  { %p356_p2 = pnand %p354_p1, %p351_p0 }
   0x8   :  { %359 = shalt.err (!%p356_p2)
}
   0x9   :  { %s434_s19 = smov [#allocation2]   ;;  %s435_s22 = smov [#allocation6]  }
   0xa   :  { %19 = dma.hbm_to_smem %s754_s0, 64, %s434_s19, [#allocation5]  }
   0xb   :  { %s25_s23 = sshll.u32 %s435_s22, 4  ;;  %s360_s26 = scalar_lea.hbm %s755_s1, 512  ;;  %s26_s23 = int_to_ptr.vmem [resolvable:$true] %s25_s23 }
   0xc   :  { %p361_p3 = scmp.ne.s32.totalorder %s755_s1, %s360_s26  ;;  %p364_p4 = scmp.lt.u32.totalorder %s360_s26, %s755_s1 }
   0xe   :  { %p366_p5 = pnand %p364_p4, %p361_p3 }
  0x10   :  { %369 = shalt.err (!%p366_p5)
}
  0x11   :  { %s370_s4 = scalar_lea.vmem %s26_s23, 512  ;;  %p375_p7 = scmp.lt.s32.totalorder %s26_s23, %s26_s23 }
  0x12   :  { %p371_p6 = scmp.ne.s32.totalorder %s26_s23, %s370_s4  ;;  %p376_p8 = scmp.lt.s32.totalorder %s370_s4, %s370_s4 }
  0x14   :  { %p377_p9 = por %p376_p8, %p375_p7 }
  0x16   :  { %p378_p10 = pnand %p377_p9, %p371_p6 }
  0x18   :  { %381 = shalt.err (!%p378_p10)
}
  0x19   :  { %s436_s0 = smov 128   ;;  %s437_s5 = smov 8  }
  0x1a   :  { %31 = dma.hbm_to_vmem [thread:$0]  %s755_s1, 512, %s26_s23, [#allocation3], %s436_s0, %s436_s0, %s437_s5  }
  0x1b   :  { %s438_s8 = smov [#allocation7]   ;;  %s382_s12 = scalar_lea.hbm %s756_s2, 512 }
  0x1c   :  { %s37_s9 = sshll.u32 %s438_s8, 4  ;;  %p383_p11 = scmp.ne.s32.totalorder %s756_s2, %s382_s12  ;;  %s38_s9 = int_to_ptr.vmem [resolvable:$true] %s37_s9 }
  0x1d   :  { %p386_p12 = scmp.lt.u32.totalorder %s382_s12, %s756_s2 }
  0x1f   :  { %p388_p13 = pnand %p386_p12, %p383_p11 }
  0x21   :  { %391 = shalt.err (!%p388_p13)
}
  0x22   :  { %s392_s17 = scalar_lea.vmem %s38_s9, 512  ;;  %p397_p1 = scmp.lt.s32.totalorder %s38_s9, %s38_s9 }
  0x23   :  { %p393_p0 = scmp.ne.s32.totalorder %s38_s9, %s392_s17  ;;  %p398_p2 = scmp.lt.s32.totalorder %s392_s17, %s392_s17 }
  0x25   :  { %p399_p3 = por %p398_p2, %p397_p1 }
  0x27   :  { %p400_p4 = pnand %p399_p3, %p393_p0 }
  0x29   :  { %403 = shalt.err (!%p400_p4)
}
  0x2a   :  { %43 = dma.hbm_to_vmem [thread:$0]  %s756_s2, 512, %s38_s9, [#allocation8], %s436_s0, %s436_s0, %s437_s5  }
  0x2b   :  { %426 = dma.done.wait [#allocation5], 64  }
  0x2c   :  { %427 = vsyncadd [#allocation5], 4294967232 }
  0x2d   :  { %428 = dma.done.wait [#allocation3], 512  }
  0x2e   :  { %429 = vsyncadd [#allocation3], 4294966784 }
  0x2f   :  { %430 = dma.done.wait [#allocation8], 512  }
  0x30   :  { %431 = vsyncadd [#allocation8], 4294966784 }
  0x31   :  { %53 = sfence }
  0x32   :  { %s503_s19 = sld [smem:[#allocation2]]  ;;  %v505_v0 = vld [vmem:[#allocation6] sm:$0xff]  ;;  %v507_v1 = vld [vmem:[#allocation6 + $0x8] sm:$0xff]  ;;  %s509_s20 = sld [smem:[#allocation2 + $0x1]]  ;;  %v513_v2 = vld [vmem:[#allocation6 + $0x10] sm:$0xff] }
  0x33   :  { %s511_s21 = sld [smem:[#allocation2 + $0x2]]  ;;  %v515_v3 = vld [vmem:[#allocation6 + $0x18] sm:$0xff]  ;;  %s517_s2 = sld [smem:[#allocation2 + $0x3]]  ;;  %v523_v4 = vsub.f32 %v513_v2, %v505_v0  ;;  %v633_v57 = vld [vmem:[#allocation7 + $0x10] sm:$0xff] }
  0x34   :  { %s519_s22 = sld [smem:[#allocation2 + $0x80]]  ;;  %v527_v5 = vsub.f32 %v515_v3, %v507_v1  ;;  %s529_s23 = sld [smem:[#allocation2 + $0x81]]  ;;  %v635_v58 = vld [vmem:[#allocation7 + $0x18] sm:$0xff] }
  0x35   :  { %s531_s24 = sld [smem:[#allocation2 + $0x82]]  ;;  %s533_s25 = sld [smem:[#allocation2 + $0x83]] }
  0x36   :  { %s535_s26 = sld [smem:[#allocation2 + $0x100]]  ;;  %s537_s27 = sld [smem:[#allocation2 + $0x101]]  ;;  %v548_v7 = vmul.f32 %v527_v5, %v523_v4 }
  0x37   :  { %s539_s28 = sld [smem:[#allocation2 + $0x102]]  ;;  %s542_s29 = sld [smem:[#allocation2 + $0x103]] }
  0x38   :  { %v70_v6 = vstv %s503_s19  ;;  %s544_s30 = sld [smem:[#allocation2 + $0x180]]  ;;  %v76_v10 = vstv %s509_s20  ;;  %s557_s6 = sld [smem:[#allocation2 + $0x181]] }
  0x39   :  { %v68_v8 = vstv %s511_s21  ;;  %v71_v9 = vmax.f32 %v505_v0, %v70_v6  ;;  %s81_s4 = ssub.f32 %s511_s21, %s503_s19  ;;  %v74_v12 = vstv %s517_s2  ;;  %v77_v13 = vmax.f32 %v507_v1, %v76_v10  ;;  %s569_s8 = sld [smem:[#allocation2 + $0x182]] }
  0x3a   :  { %v69_v11 = vmin.f32 %v513_v2, %v68_v8  ;;  %s82_s7 = ssub.f32 %s517_s2, %s509_s20  ;;  %v95_v14 = vstv %s519_s22  ;;  %v75_v15 = vmin.f32 %v515_v3, %v74_v12  ;;  %v101_v18 = vstv %s529_s23  ;;  %s581_s10 = sld [smem:[#allocation2 + $0x183]] }
  0x3b   :  { %v93_v16 = vstv %s531_s24  ;;  %v96_v17 = vmax.f32 %v505_v0, %v95_v14  ;;  %s106_s9 = ssub.f32 %s531_s24, %s519_s22  ;;  %v99_v21 = vstv %s533_s25  ;;  %v102_v22 = vmax.f32 %v507_v1, %v101_v18  ;;  %s440_s19 = smov [#allocation9]  }
  0x3c   :  { %v72_v19 = vsub.f32 %v69_v11, %v71_v9  ;;  %s83_s11 = smul.f32 %s82_s7, %s81_s4  ;;  %v94_v20 = vmin.f32 %v513_v2, %v93_v16  ;;  %s107_s12 = ssub.f32 %s533_s25, %s529_s23  ;;  %v78_v23 = vsub.f32 %v75_v15, %v77_v13  ;;  %v100_v24 = vmin.f32 %v515_v3, %v99_v21 }
  0x3d   :  { %v125_v25 = vstv %s539_s28  ;;  %v127_v26 = vstv %s535_s26  ;;  %s138_s13 = ssub.f32 %s539_s28, %s535_s26  ;;  %v131_v37 = vstv %s542_s29  ;;  %v133_v38 = vstv %s537_s27  ;;  %s289_s20 = sshll.u32 %s440_s19, 4  ;;  %s290_s20 = int_to_ptr.vmem [resolvable:$true] %s289_s20 }
  0x3e   :  { %v73_v27 = vmax.f32 %v72_v19, 0.0  ;;  %v84_v28 = vstv %s83_s11  ;;  %v97_v29 = vsub.f32 %v94_v20, %v96_v17  ;;  %s108_s14 = smul.f32 %s107_s12, %s106_s9  ;;  %v126_v30 = vmin.f32 %v513_v2, %v125_v25  ;;  %s139_s15 = ssub.f32 %s542_s29, %s537_s27 }
  0x3f   :  { %v79_v31 = vmax.f32 %v78_v23, 0.0  ;;  %v85_v32 = vadd.f32 %v84_v28, %v548_v7  ;;  %v103_v33 = vsub.f32 %v100_v24, %v102_v22  ;;  %v128_v34 = vmax.f32 %v505_v0, %v127_v26  ;;  %s170_s17 = ssub.f32 %s569_s8, %s544_s30  ;;  %s404_s21 = scalar_lea.vmem %s290_s20, 1024 }
  0x40   :  { %v98_v35 = vmax.f32 %v97_v29, 0.0  ;;  %v109_v36 = vstv %s108_s14  ;;  %s140_s16 = smul.f32 %s139_s15, %s138_s13  ;;  %s171_s1 = ssub.f32 %s581_s10, %s557_s6  ;;  %v132_v43 = vmin.f32 %v515_v3, %v131_v37  ;;  %v134_v44 = vmax.f32 %v507_v1, %v133_v38 }
  0x41   :  { %v80_v39 = vmul.f32 %v79_v31, %v73_v27  ;;  %v104_v40 = vmax.f32 %v103_v33, 0.0  ;;  %v110_v41 = vadd.f32 %v109_v36, %v548_v7  ;;  %v129_v42 = vsub.f32 %v126_v30, %v128_v34  ;;  %v647_v34 = vld [vmem:[#allocation7] sm:$0xff]  ;;  %p405_p5 = scmp.ne.s32.totalorder %s290_s20, %s404_s21  ;;  %p409_p6 = scmp.lt.s32.totalorder %s290_s20, %s290_s20 }
  0x42   :  { %v157_v45 = vstv %s569_s8  ;;  %v141_v49 = vstv %s140_s16  ;;  %v135_v50 = vsub.f32 %v132_v43, %v134_v44  ;;  %v159_v52 = vstv %s544_s30  ;;  %s172_s18 = smul.f32 %s171_s1, %s170_s17  ;;  %p410_p7 = scmp.lt.s32.totalorder %s404_s21, %s404_s21 }
  0x43   :  { %v86_v46 = vsub.f32 %v85_v32, %v80_v39  ;;  %v105_v47 = vmul.f32 %v104_v40, %v98_v35  ;;  %v130_v48 = vmax.f32 %v129_v42, 0.0  ;;  %v158_v51 = vmin.f32 %v513_v2, %v157_v45  ;;  %v649_v35 = vld [vmem:[#allocation7 + $0x8] sm:$0xff] }
  0x44   :  { %v163_v53 = vstv %s581_s10  ;;  %v160_v55 = vmax.f32 %v505_v0, %v159_v52  ;;  %v136_v59 = vmax.f32 %v135_v50, 0.0  ;;  %v142_v60 = vadd.f32 %v141_v49, %v548_v7  ;;  %p411_p8 = por %p410_p7, %p409_p6 }
  0x45   :  { %330 = vrcp.f32 %v86_v46  ;;  %v111_v54 = vsub.f32 %v110_v41, %v105_v47  ;;  %v164_v56 = vmin.f32 %v515_v3, %v163_v53  ;;  %v165_v61 = vstv %s557_s6 }
  0x46   :  { %v161_v62 = vsub.f32 %v158_v51, %v160_v55  ;;  %v166_v63 = vmax.f32 %v507_v1, %v165_v61  ;;  %v137_v2 = vmul.f32 %v136_v59, %v130_v48  ;;  %v173_v9 = vstv %s172_s18  ;;  %p412_p9 = pnand %p411_p8, %p405_p5 }
  0x47   :  { %332 = vrcp.f32 %v111_v54  ;;  %v226_v11 = vmul.f32 1.442695, %v635_v58  ;;  %v223_v13 = vmul.f32 1.442695, %v633_v57  ;;  %v174_v20 = vadd.f32 %v173_v9, %v548_v7 }
  0x48   :  { %v162_v3 = vmax.f32 %v161_v62, 0.0  ;;  %v167_v15 = vsub.f32 %v164_v56, %v166_v63  ;;  %v143_v17 = vsub.f32 %v142_v60, %v137_v2  ;;  %v186_v27 = vadd.f32 1.0, %v523_v4 }
  0x49   :  { %334 = vpow2.f32 %v223_v13  ;;  %v187_v28 = vadd.f32 1.0, %v527_v5  ;;  %v439_v56 = vmov 0.0  }
  0x4a   :  { %v168_v19 = vmax.f32 %v167_v15, 0.0  ;;  %336 = vpow2.f32 %v226_v11  ;;  %v188_v31 = vmul.f32 0.5, %v186_v27  ;;  %v219_v7 = vmul.f32 %v647_v34, %v186_v27 }
  0x4b   :  { %338 = vrcp.f32 %v143_v17  ;;  %v190_v32 = vmul.f32 0.5, %v187_v28  ;;  %v221_v36 = vmul.f32 %v649_v35, %v187_v28 }
  0x4c   :  { %v169_v22 = vmul.f32 %v168_v19, %v162_v3 }
  0x4d   :  { %v661_v41 = vadd.f32 %v190_v32, %v507_v1 }
  0x4e   :  { %v175_v24 = vsub.f32 %v174_v20, %v169_v22 }
  0x4f   :  { %v331_v23 = vpop.eup %330  ;;  %v222_v49 = vadd.f32 %v221_v36, %v661_v41 }
  0x50   :  { %v88_v29 = vmul.f32 %v331_v23, %v80_v39  ;;  %340 = vrcp.f32 %v175_v24  ;;  %v658_v39 = vadd.f32 %v188_v31, %v505_v0 }
  0x51   :  { %v333_v30 = vpop.eup %332  ;;  %342 = vrcp.f32 %v186_v27 }
  0x52   :  { %v113_v33 = vmul.f32 %v333_v30, %v105_v47  ;;  %v220_v48 = vadd.f32 %v219_v7, %v658_v39  ;;  %344 = vrcp.f32 %v187_v28 }
  0x53   :  { %v335_v40 = vpop.eup %334 }
  0x54   :  { %vm653_vm0 = vcmp.gt.f32.partialorder %v113_v33, %v88_v29  ;;  %v337_v5 = vpop.eup %336  ;;  %v225_v44 = vmul.f32 %v335_v40, %v186_v27 }
  0x55   :  { %v339_v42 = vpop.eup %338  ;;  %v115_v43 = vsel %vm653_vm0, %v113_v33, %v88_v29  ;;  %v228_v46 = vmul.f32 %v337_v5, %v187_v28  ;;  %v117_v0 = vsel %vm653_vm0, %v95_v14, %v70_v6  ;;  %v118_v51 = vsel %vm653_vm0, %v101_v18, %v76_v10 }
  0x56   :  { %v145_v47 = vmul.f32 %v339_v42, %v137_v2  ;;  %v266_v1 = vmul.f32 0.5, %v225_v44  ;;  %v119_v54 = vsel %vm653_vm0, %v93_v16, %v68_v8  ;;  %v120_v6 = vsel %vm653_vm0, %v99_v21, %v74_v12 }
  0x57   :  { %v270_v50 = vmul.f32 0.5, %v228_v46  ;;  %v116_v10 = vsel %vm653_vm0, 1.0, %v439_v56 }
  0x58   :  { %vm685_vm1 = vcmp.gt.f32.partialorder %v145_v47, %v115_v43  ;;  %v267_v16 = vsub.f32 %v220_v48, %v266_v1  ;;  %v274_v60 = vadd.f32 %v266_v1, %v220_v48 }
  0x59   :  { %v147_v14 = vsel %vm685_vm1, %v145_v47, %v115_v43  ;;  %v149_v8 = vsel %vm685_vm1, %v127_v26, %v117_v0  ;;  %v271_v59 = vsub.f32 %v222_v49, %v270_v50  ;;  %v150_v12 = vsel %vm685_vm1, %v133_v38, %v118_v51 }
  0x5a   :  { %v341_v18 = vpop.eup %340  ;;  %v151_v21 = vsel %vm685_vm1, %v125_v25, %v119_v54  ;;  %v277_v63 = vadd.f32 %v270_v50, %v222_v49  ;;  %v152_v26 = vsel %vm685_vm1, %v131_v37, %v120_v6  ;;  %269 = vst [vmem:[#allocation9 + $0x10] sm:$0xff] %v267_v16  ;;  %276 = vst [vmem:[#allocation9 + $0x20] sm:$0xff] %v274_v60  ;;  %v148_v2 = vsel %vm685_vm1, 2.0, %v116_v10 }
  0x5b   :  { %v177_v62 = vmul.f32 %v341_v18, %v169_v22  ;;  %273 = vst [vmem:[#allocation9 + $0x18] sm:$0xff] %v271_v59  ;;  %v343_v15 = vpop.eup %342 }
  0x5c   :  { %279 = vst [vmem:[#allocation9 + $0x28] sm:$0xff] %v277_v63  ;;  %v345_v20 = vpop.eup %344 }
  0x5d   :  { %vm178_vm2 = vcmp.gt.f32.partialorder %v177_v62, %v147_v14 }
  0x5e   :  { %v717_v9 = vsel %vm178_vm2, %v177_v62, %v147_v14  ;;  %v181_v38 = vsel %vm178_vm2, %v159_v52, %v149_v8  ;;  %v182_v25 = vsel %vm178_vm2, %v165_v61, %v150_v12  ;;  %v183_v11 = vsel %vm178_vm2, %v157_v45, %v151_v21 }
  0x5f   :  { %v184_v13 = vsel %vm178_vm2, %v163_v53, %v152_v26  ;;  %vm185_vm3 = vcmp.gt.f32.partialorder %v717_v9, 0.5  ;;  %v192_v37 = vsub.f32 %v183_v11, %v181_v38  ;;  %281 = vst [vmem:[#allocation9 + $0x30] sm:$0xff] %v717_v9  ;;  %v180_v3 = vsel %vm178_vm2, 3.0, %v148_v2 }
  0x60   :  { %v194_v17 = vsub.f32 %v184_v13, %v182_v25  ;;  %v322_v19 = vsel %vm185_vm3, 1.0, %v439_v56  ;;  %283 = vst [vmem:[#allocation9 + $0x38] sm:$0xff] %v180_v3 }
  0x61   :  { %v193_v52 = vadd.f32 1.0, %v192_v37  ;;  %265 = vst [vmem:[#allocation9 + $0x8] sm:$0xff] %v322_v19 }
  0x62   :  { %v195_v61 = vadd.f32 1.0, %v194_v17 }
  0x63   :  { %v196_v22 = vmul.f32 0.5, %v193_v52  ;;  %v206_v45 = vmul.f32 %v343_v15, %v193_v52 }
  0x64   :  { %v198_v23 = vmul.f32 0.5, %v195_v61  ;;  %v209_v53 = vmul.f32 %v345_v20, %v195_v61 }
  0x65   :  { %v197_v24 = vadd.f32 %v196_v22, %v181_v38  ;;  %346 = vlog2.f32 %v206_v45 }
  0x66   :  { %v199_v27 = vadd.f32 %v198_v23, %v182_v25  ;;  %348 = vlog2.f32 %v209_v53 }
  0x67   :  { %v200_v28 = vsub.f32 %v197_v24, %v658_v39 }
  0x68   :  { %v203_v29 = vsub.f32 %v199_v27, %v661_v41 }
  0x69   :  { %v202_v30 = vmul.f32 %v343_v15, %v200_v28 }
  0x6a   :  { %v205_v31 = vmul.f32 %v345_v20, %v203_v29 }
  0x6b   :  { %v229_v32 = vsub.f32 %v647_v34, %v202_v30 }
  0x6c   :  { %v236_v33 = vsub.f32 %v649_v35, %v205_v31 }
  0x6d   :  { %v230_v7 = vand.u32 2147483647, %v229_v32  ;;  %v232_v36 = vmul.f32 0.5, %v229_v32 }
  0x6e   :  { %v237_v40 = vand.u32 2147483647, %v236_v33  ;;  %v239_v4 = vmul.f32 0.5, %v236_v33 }
  0x6f   :  { %v347_v5 = vpop.eup %346  ;;  %vm231_vm4 = vcmp.lt.f32.partialorder %v230_v7, 1.0  ;;  %v233_v42 = vmul.f32 %v232_v36, %v229_v32  ;;  %v318_v43 = vadd.f32 -0.5, %v230_v7 }
  0x70   :  { %v349_v44 = vpop.eup %348  ;;  %v208_v46 = vmul.f32 0.6931472, %v347_v5  ;;  %vm238_vm5 = vcmp.lt.f32.partialorder %v237_v40, 1.0  ;;  %v240_v39 = vmul.f32 %v239_v4, %v236_v33  ;;  %v319_v47 = vadd.f32 -0.5, %v237_v40 }
  0x71   :  { %v211_v41 = vmul.f32 0.6931472, %v349_v44  ;;  %v235_v48 = vsel %vm231_vm4, %v233_v42, %v318_v43 }
  0x72   :  { %v242_v49 = vsel %vm238_vm5, %v240_v39, %v319_v47  ;;  %v244_v34 = vsub.f32 %v633_v57, %v208_v46 }
  0x73   :  { %v252_v35 = vsub.f32 %v635_v58, %v211_v41  ;;  %v243_v50 = vadd.f32 %v242_v49, %v235_v48 }
  0x74   :  { %v245_v0 = vand.u32 2147483647, %v244_v34  ;;  %v247_v1 = vmul.f32 0.5, %v244_v34 }
  0x75   :  { %v253_v51 = vand.u32 2147483647, %v252_v35  ;;  %v255_v54 = vmul.f32 0.5, %v252_v35 }
  0x76   :  { %vm246_vm6 = vcmp.lt.f32.partialorder %v245_v0, 1.0  ;;  %v248_v55 = vmul.f32 %v247_v1, %v244_v34  ;;  %v320_v6 = vadd.f32 -0.5, %v245_v0 }
  0x77   :  { %vm254_vm7 = vcmp.lt.f32.partialorder %v253_v51, 1.0  ;;  %v256_v14 = vmul.f32 %v255_v54, %v252_v35  ;;  %v321_v56 = vadd.f32 -0.5, %v253_v51 }
  0x78   :  { %v250_v10 = vsel %vm246_vm6, %v248_v55, %v320_v6 }
  0x79   :  { %v251_v18 = vadd.f32 %v250_v10, %v243_v50  ;;  %v258_v8 = vsel %vm254_vm7, %v256_v14, %v321_v56 }
  0x7b   :  { %v259_v16 = vadd.f32 %v258_v8, %v251_v18 }
  0x7d   :  { %v260_v57 = vsel %vm185_vm3, %v259_v16, 0.0 }
  0x7e   :  { %261 = vst [vmem:[#allocation9] sm:$0xff] %v260_v57 }
  0x7f   :  { %415 = shalt.err (!%p412_p9)
}
  0x80   :  { %s416_s23 = scalar_lea.hbm %s757_s3, 1024 }
  0x81   :  { %p417_p10 = scmp.ne.s32.totalorder %s757_s3, %s416_s23  ;;  %p420_p11 = scmp.lt.u32.totalorder %s416_s23, %s757_s3 }
  0x83   :  { %p422_p12 = pnand %p420_p11, %p417_p10 }
  0x85   :  { %425 = shalt.err (!%p422_p12)
}
  0x86   :  { %295 = dma.vmem_to_hbm [thread:$0]  %s290_s20, 1024, %s757_s3, [#allocation4], %s436_s0, %s436_s0, %s437_s5  }
  0x87   :  { %432 = dma.done.wait [#allocation4], 1024  }
  0x88   :  { %433 = vsyncadd [#allocation4], 4294966272 }
  0x89   :  { %299 = vsyncpa [#allocation3], 1 }
  0x8a   :  { %300 = vsyncpa [#allocation8], 1 }
  0x8b   :  { %301 = vsyncpa [#allocation4], 1 }
  0x8c   :  { %302 = vsyncpa [#allocation5], 1 }

</bundles_post_ra>
